<compile_context>
chip_gen: v7x
topology: tpu7x:2x2x1
jax: 0.10.0
libtpu: 0.0.40
codegen_flags: <defaults>
</compile_context>

<pallas_src>
import math

import jax
import jax.numpy as jnp
from jax import lax
from jax.experimental import pallas as pl
from jax.experimental.pallas import tpu as pltpu

_LANES = 128
_SUBLANES = 8
_TARGET_ROWS = 8192     # 8192 x 128 x 4B = 4 MiB per f32 input tile
_CHUNK_ROWS = 512       # rows per inner compute chunk (256 KiB f32 temporaries)


def _round_up(a, b):
    return ((a + b - 1) // b) * b


def _cdiv(a, b):
    return (a + b - 1) // b


def _min_row_align(dtype):
    # Native second-minor tile is 32 bytes / itemsize (f32->8, bf16->16, u8->32).
    return max(_SUBLANES, 32 // max(1, jnp.dtype(dtype).itemsize))


def _pow(d, gamma):
    if gamma == 2:
        return d * d
    if gamma == 1:
        return d
    if gamma == 3:
        return d * d * d
    if gamma == 0:
        return jnp.ones_like(d)
    return jnp.power(d, jnp.float32(gamma))


def _make_focal_kernel(alpha, gamma, rows_per_tile, chunk_rows, n_valid,
                       needs_mask):
    alpha = float(alpha)
    assert rows_per_tile % chunk_rows == 0
    assert chunk_rows % _SUBLANES == 0
    n_chunks = rows_per_tile // chunk_rows

    def kernel(x_ref, y_ref, out_ref):
        if needs_mask:
            # Flat element index of each slot in a chunk (computed once,
            # hoisted out of the unrolled loop).
            row_id = lax.broadcasted_iota(jnp.int32, (chunk_rows, _LANES), 0)
            lane_id = lax.broadcasted_iota(jnp.int32, (chunk_rows, _LANES), 1)
            local_idx = row_id * _LANES + lane_id
            tile_base = pl.program_id(0) * (rows_per_tile * _LANES)

        def body(c, acc):
            r0 = pl.multiple_of(c * chunk_rows, chunk_rows)
            x = x_ref[pl.ds(r0, chunk_rows), :].astype(jnp.float32)
            y = y_ref[pl.ds(r0, chunk_rows), :].astype(jnp.float32)

            # Shared transcendental: e = exp(-|x|)
            #   sigmoid(x)          = 1/(1+e)   (x >= 0)   or   e/(1+e)  (x < 0)
            #   log(sigmoid(x))     = min(x, 0)  - log1p(e)
            #   log(1 - sigmoid(x)) = min(-x, 0) - log1p(e)
            # (Matches F.softplus(., +-1, 50) branches of the PyTorch module;
            #  the threshold branch is never active inside the selected sides.)
            e = jnp.exp(-jnp.abs(x))
            log1p_e = jnp.log1p(e)
            inv = 1.0 / (1.0 + e)
            probs = jnp.where(x >= 0.0, inv, e * inv)

            log_probs = jnp.minimum(x, 0.0) - log1p_e
            log_1_probs = jnp.minimum(-x, 0.0) - log1p_e

            coeff = -_pow(jnp.abs(y - probs), gamma)
            loss = (y * alpha * log_probs
                    + (1.0 - y) * (1.0 - alpha) * log_1_probs) * coeff

            if needs_mask:
                # Kill padded elements and garbage rows of a ragged last tile
                # (select, not multiply, so NaN/Inf garbage cannot leak).
                idx = tile_base + r0 * _LANES + local_idx
                loss = jnp.where(idx < n_valid, loss, 0.0)

            # Reduce the chunk to a single (8,128) vreg with vreg-wise adds
            # only (no cross-lane XLU work, no scalar RMW).
            return acc + jnp.sum(
                loss.reshape(chunk_rows // _SUBLANES, _SUBLANES, _LANES),
                axis=0)

        acc0 = jnp.zeros((_SUBLANES, _LANES), jnp.float32)
        acc = lax.fori_loop(0, n_chunks, body, acc0, unroll=True)
        out_ref[...] = acc

    return kernel


def focal_loss(logits, label, alpha=0.75, gamma=2, reduction="mean"):
    """Pallas TPU implementation of FocalLoss.forward (scalar reductions)."""
    if reduction not in ("mean", "sum", "batchmean"):
        raise ValueError(f"unknown reduction {reduction!r}")
        # TODO(synk): reduction='none' (full elementwise map output) is not
        # wired up; only scalar reductions are supported.

    shape = logits.shape
    n = int(math.prod(shape))

    x = jnp.reshape(logits, (-1,))
    y = jnp.reshape(label, (-1,))

    # Keep HBM traffic narrow: do NOT widen labels/logits here; the f32 cast
    # happens inside the kernel. Only rewrite dtypes Mosaic dislikes.
    if y.dtype == jnp.bool_:
        y = y.astype(jnp.uint8)
    elif jnp.issubdtype(y.dtype, jnp.integer) and jnp.dtype(y.dtype).itemsize > 4:
        y = y.astype(jnp.int32)

    row_align = max(_min_row_align(x.dtype), _min_row_align(y.dtype))

    rows = _cdiv(n, _LANES)
    rows_p = max(rows, row_align)          # array needs >= one aligned block
    n_store = rows_p * _LANES
    if n_store != n:
        # TODO(synk): only flat sizes not divisible by 128 (or tiny inputs)
        # take this pad; it is an extra copy that the in-kernel masking makes
        # semantically irrelevant (pad values never reach the sum).
        x = jnp.pad(x, (0, n_store - n))
        y = jnp.pad(y, (0, n_store - n))
    x2 = x.reshape(rows_p, _LANES)
    y2 = y.reshape(rows_p, _LANES)

    # Tile sizing: big tiles for DMA efficiency, but keep grid >= 2 when there
    # is enough work (v7x has 2 TensorCores), and never let the block exceed
    # the array rows.
    if rows_p <= 2 * _CHUNK_ROWS:
        rpt = _round_up(_cdiv(rows_p, 2), row_align)
    else:
        rpt = min(_TARGET_ROWS, _round_up(_cdiv(rows_p, 2), _CHUNK_ROWS))
    rpt = max(row_align, min(rpt, (rows_p // row_align) * row_align))
    chunk = _CHUNK_ROWS if rpt % _CHUNK_ROWS == 0 else rpt
    grid = _cdiv(rows_p, rpt)

    needs_mask = (grid * rpt * _LANES) != n
    if needs_mask and grid * rpt * _LANES >= 2 ** 31:
        # TODO(synk): flat-index masking uses int32; >=2^31-element inputs
        # would need row-based or int64 masking.
        raise NotImplementedError("input too large for int32 index masking")

    kernel = _make_focal_kernel(alpha, gamma, rpt, chunk, n, needs_mask)

    partials = pl.pallas_call(
        kernel,
        out_shape=jax.ShapeDtypeStruct((grid, _SUBLANES, _LANES), jnp.float32),
        grid_spec=pltpu.PrefetchScalarGridSpec(
            num_scalar_prefetch=0,
            grid=(grid,),
            in_specs=[
                pl.BlockSpec((rpt, _LANES), lambda i: (i, 0)),
                pl.BlockSpec((rpt, _LANES), lambda i: (i, 0)),
            ],
            out_specs=pl.BlockSpec((None, _SUBLANES, _LANES),
                                   lambda i: (i, 0, 0)),
        ),
        compiler_params=pltpu.CompilerParams(
            dimension_semantics=("parallel",),
            vmem_limit_bytes=32 * 1024 * 1024),
    )(x2, y2)

    total = jnp.sum(partials)

    if reduction == "mean":
        return total / jnp.float32(n)
    if reduction == "sum":
        return total
    # batchmean: loss.mean(0).sum() == total_sum / batch_size
    return total / jnp.float32(shape[0])


def _focal_loss_ref(logits, label, alpha=0.75, gamma=2, reduction="mean"):
    """Pure-JAX reference mirroring the PyTorch forward (for verification)."""
    x = logits.astype(jnp.float32)
    y = label.astype(jnp.float32)
    probs = jax.nn.sigmoid(x)
    coeff = -jnp.power(jnp.abs(y - probs), gamma)
    sp_neg = jnp.where(-x > 50.0, x, -jnp.log1p(jnp.exp(-x)))
    sp_pos = jnp.where(x > 50.0, x, jnp.log1p(jnp.exp(x)))
    log_probs = jnp.where(x >= 0.0, sp_neg, x - sp_pos)
    log_1_probs = jnp.where(x >= 0.0, -x + sp_neg, -sp_pos)
    loss = y * alpha * log_probs + (1.0 - y) * (1.0 - alpha) * log_1_probs
    loss = loss * coeff
    if reduction == "mean":
        return loss.mean()
    if reduction == "sum":
        return loss.sum()
    if reduction == "batchmean":
        return loss.mean(0).sum()
    return loss


if __name__ == "__main__":
    key = jax.random.PRNGKey(0)
    k1, k2, k3, k4, k5, k6 = jax.random.split(key, 6)

    # Small NCHW shape consistent with the module's usage example.
    B, C, H, W = 2, 4, 16, 16
    logits = jax.random.normal(k1, (B, C, H, W), dtype=jnp.float32)
    label = jax.random.bernoulli(k2, 0.5, (B, C, H, W)).astype(jnp.float32)
    out = focal_loss(logits, label, alpha=0.75, gamma=2, reduction="mean")
    out = jax.block_until_ready(out)
    ref = _focal_loss_ref(logits, label, alpha=0.75, gamma=2, reduction="mean")
    assert jnp.allclose(out, ref, rtol=1e-5, atol=1e-6), (out, ref)

    # Odd shape exercising the small lane-pad + masking path + batchmean.
    logits2 = jax.random.normal(k3, (2, 3, 15, 17), dtype=jnp.float32)
    label2 = jax.random.bernoulli(k4, 0.5, (2, 3, 15, 17)).astype(jnp.float32)
    out2 = focal_loss(logits2, label2, alpha=0.75, gamma=2,
                      reduction="batchmean")
    out2 = jax.block_until_ready(out2)
    ref2 = _focal_loss_ref(logits2, label2, alpha=0.75, gamma=2,
                           reduction="batchmean")
    assert jnp.allclose(out2, ref2, rtol=1e-5, atol=1e-6), (out2, ref2)

    # Larger (still modest) shape exercising the multi-chunk fori_loop and a
    # ragged last grid tile (masked garbage rows), with sum reduction.
    logits3 = jax.random.normal(k5, (2, 4, 128, 144), dtype=jnp.float32)
    label3 = jax.random.bernoulli(k6, 0.5, (2, 4, 128, 144)).astype(jnp.float32)
    out3 = focal_loss(logits3, label3, alpha=0.75, gamma=2, reduction="sum")
    out3 = jax.block_until_ready(out3)
    ref3 = _focal_loss_ref(logits3, label3, alpha=0.75, gamma=2,
                           reduction="sum")
    assert jnp.allclose(out3, ref3, rtol=5e-5, atol=1e-2), (out3, ref3)

    print("KERNEL_OK")
</pallas_src>

<mosaic_0001>
module attributes {stable_mosaic.version = 11 : i64} {
  func.func @kernel(%arg0: i32, %arg1: memref<8x128xf32, #tpu.memory_space<vmem>>, %arg2: memref<8x128xf32, #tpu.memory_space<vmem>>, %arg3: memref<1x8x128xf32, #tpu.memory_space<vmem>>) attributes {dimension_semantics = [#tpu.dimension_semantics<parallel>], iteration_bounds = array<i64: 2>, scalar_prefetch = 0 : i64, scratch_operands = 0 : i64, tpu.core_type = #tpu.core_type<tc>, window_params = [{transform_indices = @transform_0, window_bounds = array<i64: 8, 128>}, {transform_indices = @transform_1, window_bounds = array<i64: 8, 128>}, {transform_indices = @transform_2, window_bounds = array<i64: 1, 8, 128>}]} {
    %cst = arith.constant 0.000000e+00 : f32
    %0 = vector.broadcast %cst : f32 to vector<8x128xf32>
    %c0_i32 = arith.constant 0 : i32
    %c8_i32 = arith.constant 8 : i32
    %1 = arith.muli %c0_i32, %c8_i32 : i32
    %2 = tpu.assume_multiple %1, 8 : i32
    %3 = arith.index_cast %2 : i32 to index
    %c0 = arith.constant 0 : index
    %4 = vector.load %arg1[%3, %c0] : memref<8x128xf32, #tpu.memory_space<vmem>>, vector<8x128xf32>
    %5 = arith.index_cast %2 : i32 to index
    %c0_0 = arith.constant 0 : index
    %6 = vector.load %arg2[%5, %c0_0] : memref<8x128xf32, #tpu.memory_space<vmem>>, vector<8x128xf32>
    %7 = math.absf %4 : vector<8x128xf32>
    %cst_1 = arith.constant 0.000000e+00 : f32
    %8 = vector.broadcast %cst_1 : f32 to vector<8x128xf32>
    %9 = arith.subf %8, %7 : vector<8x128xf32>
    %10 = math.exp %9 : vector<8x128xf32>
    %11 = math.log1p %10 : vector<8x128xf32>
    %cst_2 = arith.constant 1.000000e+00 : f32
    %12 = vector.broadcast %cst_2 : f32 to vector<8x128xf32>
    %13 = arith.addf %12, %10 : vector<8x128xf32>
    %cst_3 = arith.constant 1.000000e+00 : f32
    %14 = vector.broadcast %cst_3 : f32 to vector<8x128xf32>
    %15 = arith.divf %14, %13 : vector<8x128xf32>
    %cst_4 = arith.constant 0.000000e+00 : f32
    %16 = vector.broadcast %cst_4 : f32 to vector<8x128xf32>
    %17 = arith.cmpf oge, %4, %16 : vector<8x128xf32>
    %18 = arith.mulf %10, %15 : vector<8x128xf32>
    %19 = arith.select %17, %15, %18 : vector<8x128xi1>, vector<8x128xf32>
    %cst_5 = arith.constant 0.000000e+00 : f32
    %20 = vector.broadcast %cst_5 : f32 to vector<8x128xf32>
    %21 = arith.minimumf %4, %20 : vector<8x128xf32>
    %22 = arith.subf %21, %11 : vector<8x128xf32>
    %cst_6 = arith.constant 0.000000e+00 : f32
    %23 = vector.broadcast %cst_6 : f32 to vector<8x128xf32>
    %24 = arith.subf %23, %4 : vector<8x128xf32>
    %cst_7 = arith.constant 0.000000e+00 : f32
    %25 = vector.broadcast %cst_7 : f32 to vector<8x128xf32>
    %26 = arith.minimumf %24, %25 : vector<8x128xf32>
    %27 = arith.subf %26, %11 : vector<8x128xf32>
    %28 = arith.subf %6, %19 : vector<8x128xf32>
    %29 = math.absf %28 : vector<8x128xf32>
    %30 = arith.mulf %29, %29 : vector<8x128xf32>
    %cst_8 = arith.constant 0.000000e+00 : f32
    %31 = vector.broadcast %cst_8 : f32 to vector<8x128xf32>
    %32 = arith.subf %31, %30 : vector<8x128xf32>
    %cst_9 = arith.constant 7.500000e-01 : f32
    %33 = vector.broadcast %cst_9 : f32 to vector<8x128xf32>
    %34 = arith.mulf %6, %33 : vector<8x128xf32>
    %35 = arith.mulf %34, %22 : vector<8x128xf32>
    %cst_10 = arith.constant 1.000000e+00 : f32
    %36 = vector.broadcast %cst_10 : f32 to vector<8x128xf32>
    %37 = arith.subf %36, %6 : vector<8x128xf32>
    %cst_11 = arith.constant 2.500000e-01 : f32
    %38 = vector.broadcast %cst_11 : f32 to vector<8x128xf32>
    %39 = arith.mulf %37, %38 : vector<8x128xf32>
    %40 = arith.mulf %39, %27 : vector<8x128xf32>
    %41 = arith.addf %35, %40 : vector<8x128xf32>
    %42 = arith.mulf %41, %32 : vector<8x128xf32>
    %43 = vector.shape_cast %42 : vector<8x128xf32> to vector<1x8x128xf32>
    %cst_12 = arith.constant dense<0.000000e+00> : vector<8x128xf32>
    %44 = vector.multi_reduction <add>, %43, %cst_12 [0] : vector<1x8x128xf32> to vector<8x128xf32>
    %45 = arith.addf %0, %44 : vector<8x128xf32>
    %c1_i32 = arith.constant 1 : i32
    %c0_13 = arith.constant 0 : index
    %c0_14 = arith.constant 0 : index
    %c0_15 = arith.constant 0 : index
    %46 = vector.load %arg3[%c0_13, %c0_14, %c0_15] : memref<1x8x128xf32, #tpu.memory_space<vmem>>, vector<1x8x128xf32>
    %47 = vector.shape_cast %46 : vector<1x8x128xf32> to vector<8x128xf32>
    %48 = vector.shape_cast %45 : vector<8x128xf32> to vector<1x8x128xf32>
    tpu.vector_store %arg3[%c0_13, %c0_14, %c0_15], %48 {strides = array<i32>} : memref<1x8x128xf32, #tpu.memory_space<vmem>>, vector<1x8x128xf32>,
    return
  }
  func.func @transform_0(%arg0: i32) -> (i32, i32) {
    %c0_i32 = arith.constant 0 : i32
    %c0_i32_0 = arith.constant 0 : i32
    return %arg0, %c0_i32 : i32, i32
  }
  func.func @transform_1(%arg0: i32) -> (i32, i32) {
    %c0_i32 = arith.constant 0 : i32
    %c0_i32_0 = arith.constant 0 : i32
    return %arg0, %c0_i32 : i32, i32
  }
  func.func @transform_2(%arg0: i32) -> (i32, i32, i32) {
    %c0_i32 = arith.constant 0 : i32
    %c0_i32_0 = arith.constant 0 : i32
    %c0_i32_1 = arith.constant 0 : i32
    return %arg0, %c0_i32, %c0_i32_0 : i32, i32, i32
  }
}

</mosaic_0001>

<bundles_post_ra>
// kernel: tpu_custom_call.1
= control target key start
LH: loop header
LB: loop body
LE: loop exit
PB: predicated region body
PF: predicated region fallthrough
CT: control target
= control target key end

     0   :  { %7 = vsyncpa [#allocation3], 0  ;;  %s779_s0 = inlined_call_operand.hbm [shape: f32[16,128], index: 0, kind: input, shape index: {}]   ;;  %s780_s1 = inlined_call_operand.hbm [shape: f32[16,128], index: 1, kind: input, shape index: {}]   ;;  %s781_s2 = inlined_call_operand.hbm [shape: f32[2,8,128], index: 2, kind: output, shape index: {}]  }
   0x1   :  { %9 = vsyncpa [#allocation3 + $0x1], 0 }
   0x2   :  { %10 = vsyncpa [#allocation6], 0 }
   0x3   :  { %12 = vsyncpa [#allocation6 + $0x1], 0 }
   0x4   :  { %13 = vsyncpa [#allocation4], 0 }
   0x5   :  { %15 = vsyncpa [#allocation4 + $0x1], 0  ;;  %s565_s9 = smov 0   ;;  %s567_s10 = smov 0  }
   0x6   :  { %s569_s11 = smov 0   ;;  %s571_s12 = smov 0  }
   0x7 LB: > { %s586_s13 = sadd.s32 4294967295, %s545_s12   ;;  %s343_s14 = sadd.s32 4294967294, %s545_s12   ;;  %s545_s12 = sphi %s571_s12, %s800_s12   ;;  %s541_s11 = sphi %s569_s11, %s799_s11   ;;  %s537_s10 = sphi %s567_s10, %s798_s10   ;;  %s533_s9 = sphi %s565_s9, %s797_s9  }
   0x8   : > { %s590_s15 = sadd.s32 1, %s545_s12   ;;  %s28_s16 = sadd.s32 1, %s541_s11 }
   0x9   : > { %s25_s17 = ssub.s32 %s545_s12, %s590_s15  ;;  %p35_p0 = scmp.ne.s32.totalorder %s541_s11, %s537_s10 }
   0xa   : > { %p26_p1 = scmp.eq.s32.totalorder %s25_s17, 0  ;;  %p36_p2 = scmp.eq.s32.totalorder %s545_s12, 0 }
   0xb   : > { %p41_p3 = scmp.ne.s32.totalorder %s537_s10, %s533_s9  ;;  %p42_p4 = scmp.eq.s32.totalorder %s586_s13, 0 }
   0xc   : > { %s602_s18 = scalar_select %p26_p1, %s541_s11, %s28_s16  }
   0xd   : > { %p604_p5 = por %p36_p2, %p35_p0  ;;  %p608_p6 = por %p42_p4, %p41_p3 }
   0xe   : > { %p91_p7 = scmp.eq.s32.totalorder %s586_s13, 1  ;;  %p97_p8 = scmp.eq.s32.totalorder %s343_s14, 1 }
   0xf   : > { %s785_s20 = scalar_select %p608_p6, 1, 0 }
  0x10   : > { %p375_p10 = scmp.lt.s32.totalorder %s545_s12, 2  ;;  %p615_p11 = por %p91_p7, %p35_p0 }
  0x11   : > { %p619_p12 = por %p97_p8, %p41_p3  ;;  %s624_s23 = sand.u32 1, %s541_s11  }
  0x12   : > { %s786_s21 = scalar_select %p615_p11, 1, 0 }
  0x13   : > { %s787_s22 = scalar_select %p619_p12, 1, 0 }
  0x14   : > { %s347_s24 = sshll.u32 %s545_s12, 7  ;;  %s346_s25 = sshll.u32 %s624_s23, 3 }
  0x15   : > { %s633_s28 = scalar_lea.hbm %s779_s0, %s347_s24  ;;  %s121_s29 = scalar_lea.vmem [#allocation2], %s346_s25 }
  0x16   : > { %s128_s30 = sshll.u32 %s121_s29, 4  ;;  %p639_p13 = pnand %p375_p10, %p604_p5  ;;  %s643_s30 = int_to_ptr.vmem [resolvable:$true] %s128_s30 }
  0x17   : > { %s118_s4 = scalar_lea.sflag [#allocation3], %s624_s23  ;;  %s415_s5 = scalar_lea.hbm %s633_s28, 128 }
  0x18   : > { %p416_p2 = scmp.ne.s32.totalorder %s633_s28, %s415_s5  ;;  %p417_p3 = pneg %p639_p13 }
  0x19   : > { %s420_s8 = scalar_lea.hbm %s779_s0, 256  ;;  %p421_p5 = scmp.lt.u32.totalorder %s633_s28, %s779_s0 }
  0x1a   : > { %p418_p4 = pnand %p417_p3, %p416_p2  ;;  %p422_p8 = scmp.lt.u32.totalorder %s420_s8, %s415_s5 }
  0x1b   : > { %p424_p9 = scmp.lt.u32.totalorder %s415_s5, %s633_s28 }
  0x1c   : > { %p419_p7 = pneg %p418_p4  ;;  %p423_p10 = por %p422_p8, %p421_p5 }
  0x1e   : > { %p425_p0 = por %p424_p9, %p423_p10 }
  0x20   : > { %p426_p1 = pnand %p425_p0, %p419_p7 }
  0x22   : > { %429 = shalt.err (!%p426_p1)
}
  0x23   : > { %s430_s17 = scalar_lea.vmem %s643_s30, 128  ;;  %s547_s19 = smov [#allocation2]  }
  0x24   : > { %p431_p2 = scmp.ne.s32.totalorder %s643_s30, %s430_s17  ;;  %s435_s26 = sshll.u32 %s547_s19, 4  ;;  %s436_s26 = int_to_ptr.vmem [resolvable:$false] %s435_s26 }
  0x25   : > { %s437_s27 = scalar_lea.vmem %s436_s26, 256  ;;  %p438_p11 = scmp.lt.s32.totalorder %s643_s30, %s436_s26 }
  0x26   : > { %p433_p4 = pnand %p431_p2, %p417_p3  ;;  %p439_p5 = scmp.lt.s32.totalorder %s437_s27, %s430_s17 }
  0x28   : > { %p434_p12 = pneg %p433_p4  ;;  %p440_p8 = por %p439_p5, %p438_p11 }
  0x2a   : > { %p441_p9 = pnand %p440_p8, %p434_p12 }
  0x2c   : > { %444 = shalt.err (!%p441_p9)
}
  0x2d   : > { %367 = dma.hbm_to_vmem [thread:$0]  (!%p639_p13), %s633_s28, 128, %s643_s30, %s118_s4  }
  0x2e   : > { %p789_p0 = scmp.lt.s32.totalorder %s545_s12, 3  ;;  %p790_p1 = scmp.ge.s32.totalorder %s545_s12, 1 }
  0x2f   : > { %s686_s7 = scalar_lea.hbm %s780_s1, %s347_s24  ;;  %s139_s8 = scalar_lea.vmem [#allocation5], %s346_s25 }
  0x30   : > { %p677_p7 = pnand %p790_p1, %p789_p0  ;;  %s146_s14 = sshll.u32 %s139_s8, 4  ;;  %s147_s14 = int_to_ptr.vmem [resolvable:$true] %s146_s14 }
  0x31   : > { %s136_s28 = scalar_lea.sflag [#allocation6], %s624_s23  ;;  %s445_s30 = scalar_lea.hbm %s686_s7, 128 }
  0x32   : > { %s791_s29 = scalar_select %p677_p7, 1, 0 }
  0x33   : > { %p446_p11 = scmp.ne.s32.totalorder %s686_s7, %s445_s30  ;;  %s450_s24 = scalar_lea.hbm %s780_s1, 256 }
  0x34   : > { %p451_p2 = scmp.lt.u32.totalorder %s686_s7, %s780_s1  ;;  %p452_p4 = scmp.lt.u32.totalorder %s450_s24, %s445_s30 }
  0x35   : > { %p448_p12 = pnand %p446_p11, %p417_p3  ;;  %p454_p8 = scmp.lt.u32.totalorder %s445_s30, %s686_s7 }
  0x36   : > { %p453_p5 = por %p452_p4, %p451_p2 }
  0x37   : > { %p449_p10 = pneg %p448_p12 }
  0x38   : > { %p455_p9 = por %p454_p8, %p453_p5 }
  0x3a   : > { %p456_p0 = pnand %p455_p9, %p449_p10 }
  0x3c   : > { %459 = shalt.err (!%p456_p0)
}
  0x3d   : > { %s460_s23 = scalar_lea.vmem %s147_s14, 128  ;;  %s548_s25 = smov [#allocation5]  }
  0x3e   : > { %p461_p1 = scmp.ne.s32.totalorder %s147_s14, %s460_s23  ;;  %s465_s26 = sshll.u32 %s548_s25, 4  ;;  %s466_s26 = int_to_ptr.vmem [resolvable:$false] %s465_s26 }
  0x3f   : > { %s467_s27 = scalar_lea.vmem %s466_s26, 256  ;;  %p468_p6 = scmp.lt.s32.totalorder %s147_s14, %s466_s26 }
  0x40   : > { %p463_p11 = pnand %p461_p1, %p417_p3  ;;  %p469_p7 = scmp.lt.s32.totalorder %s467_s27, %s460_s23 }
  0x42   : > { %p464_p12 = pneg %p463_p11  ;;  %p470_p2 = por %p469_p7, %p468_p6 }
  0x44   : > { %p471_p4 = pnand %p470_p2, %p464_p12 }
  0x46   : > { %474 = shalt.err (!%p471_p4)
}
  0x47   : > { %370 = dma.hbm_to_vmem [thread:$0]  (!%p639_p13), %s686_s7, 128, %s147_s14, %s136_s28  }
  0x48   : > { %p792_p10 = scmp.ne.s32.totalorder %s791_s29, 0 }
  0x49   : > { %s713_s5 = sand.u32 (!%p792_p10), 1, %s537_s10   ;;  %p793_p6 = scmp.ne.s32.totalorder (!%p792_p10), %s785_s20, 0 }
  0x4a   : > { %155 = sbr.rel (%p792_p10) target bundleno = 143 (0x8f), region = 28  ;;  %s716_s6 = sshll.u32 (!%p792_p10), %s713_s5, 3 }
  0x4b   : > { %s158_s8 = scalar_lea.sflag (!%p792_p10), [#allocation3], %s713_s5  ;;  %s161_s30 = scalar_lea.vmem (!%p792_p10), [#allocation2], %s716_s6 }
  0x51   : > { %520 = dma.done.wait (%p793_p6), %s158_s8, 128  }
  0x52   : > { %522 = vsyncadd (%p793_p6), %s158_s8, 4294967168  ;;  %s167_s3 = scalar_lea.sflag [#allocation6], %s713_s5  ;;  %s170_s29 = scalar_lea.vmem [#allocation5], %s716_s6 }
  0x53   : > { %524 = dma.done.wait (%p793_p6), %s167_s3, 128  }
  0x54   : > { %526 = vsyncadd (%p793_p6), %s167_s3, 4294967168  ;;  %v196_v0 = vld [vmem:[%s161_s30] sm:$0xff]  ;;  %v197_v7 = vld [vmem:[%s170_s29] sm:$0xff]  ;;  %s195_s20 = scalar_lea.vmem [#allocation7], %s716_s6  ;;  %s355_s14 = sshll.u32 %s586_s13, 7 }
  0x55   : > { %v198_v1 = vand.u32 2147483647, %v196_v0  ;;  %v219_v10 = vsub.f32 0.0, %v196_v0  ;;  %v228_v11 = vsub.f32 1.0, %v197_v7  ;;  %v217_v14 = vmin.f32 %v196_v0, 0.0  ;;  %s250_s7 = sshll.u32 %s195_s20, 4  ;;  %s737_s16 = scalar_lea.hbm %s781_s2, %s355_s14  ;;  %s732_s7 = int_to_ptr.vmem [resolvable:$true] %s250_s7 }
  0x56   : > { %vm214_vm1 = vcmp.ge.f32.partialorder %v196_v0, 0.0  ;;  %v226_v19 = vmul.f32 0.75, %v197_v7  ;;  %s237_s24 = scalar_lea.sflag [#allocation4], %s713_s5  ;;  %s475_s17 = scalar_lea.vmem %s732_s7, 128 }
  0x57   : > { %v199_v2 = vsub.f32 0.0, %v198_v1  ;;  %v220_v15 = vmin.f32 %v219_v10, 0.0  ;;  %v229_v20 = vmul.f32 0.25, %v228_v11  ;;  %p476_p13 = scmp.ne.s32.totalorder %s732_s7, %s475_s17  ;;  %p794_p3 = scmp.ne.s32.totalorder %s786_s21, 0 }
  0x58   : > { %s549_s13 = smov [#allocation7]  }
  0x59   : > { %v200_v3 = vmul.f32 1.442695, %v199_v2  ;;  %p477_p7 = pnand %p476_p13, %p794_p3  ;;  %s479_s19 = sshll.u32 %s549_s13, 4  ;;  %s480_s19 = int_to_ptr.vmem [resolvable:$false] %s479_s19 }
  0x5a   : > { %s481_s23 = scalar_lea.vmem %s480_s19, 256  ;;  %p482_p8 = scmp.lt.s32.totalorder %s732_s7, %s480_s19 }
  0x5b   : > { %409 = vpow2.f32 %v200_v3  ;;  %p478_p5 = pneg %p477_p7  ;;  %p483_p9 = scmp.lt.s32.totalorder %s481_s23, %s475_s17 }
  0x5d   : > { %p484_p0 = por %p483_p9, %p482_p8 }
  0x5f   : > { %p485_p1 = pnand %p484_p0, %p478_p5 }
  0x65   : > { %v410_v4 = vpop.eup %409 }
  0x66   : > { %v202_v5 = vadd.f32 1.0, %v410_v4  ;;  %v205_v6 = vmul.f32 -0.5, %v410_v4  ;;  %v208_v9 = vand.u32 2147483647, %v410_v4 }
  0x68   : > { %411 = vlog2.f32 %v202_v5  ;;  %v206_v8 = vadd.f32 1.0, %v205_v6  ;;  %vm209_vm0 = vcmp.lt.f32.partialorder %v208_v9, 0.0004427343 }
  0x69   : > { %413 = vrcp.f32 %v202_v5 }
  0x6a   : > { %v207_v12 = vmul.f32 %v410_v4, %v206_v8 }
  0x72   : > { %v412_v13 = vpop.eup %411 }
  0x73   : > { %v414_v16 = vpop.eup %413  ;;  %v204_v17 = vmul.f32 0.6931472, %v412_v13 }
  0x74   : > { %v215_v18 = vmul.f32 %v414_v16, %v410_v4 }
  0x75   : > { %v210_v21 = vsel %vm209_vm0, %v207_v12, %v204_v17 }
  0x76   : > { %v216_v22 = vsel %vm214_vm1, %v414_v16, %v215_v18  ;;  %v218_v23 = vsub.f32 %v217_v14, %v210_v21  ;;  %v221_v24 = vsub.f32 %v220_v15, %v210_v21 }
  0x77   : > { %v222_v25 = vsub.f32 %v197_v7, %v216_v22 }
  0x78   : > { %v227_v26 = vmul.f32 %v226_v19, %v218_v23  ;;  %v230_v27 = vmul.f32 %v229_v20, %v221_v24 }
  0x79   : > { %v223_v28 = vand.u32 2147483647, %v222_v25 }
  0x7a   : > { %v231_v30 = vadd.f32 %v230_v27, %v227_v26 }
  0x7b   : > { %v224_v29 = vmul.f32 %v223_v28, %v223_v28 }
  0x7d   : > { %v225_v31 = vsub.f32 0.0, %v224_v29 }
  0x7f   : > { %v232_v32 = vmul.f32 %v231_v30, %v225_v31 }
  0x81   : > { %235 = vst [vmem:[%s195_s20] sm:$0xff] %v232_v32 }
  0x82   : > { %488 = shalt.err (!%p485_p1)
}
  0x83   : > { %s489_s25 = scalar_lea.hbm %s737_s16, 128  ;;  %s493_s5 = scalar_lea.hbm %s781_s2, 256 }
  0x84   : > { %p490_p11 = scmp.ne.s32.totalorder %s737_s16, %s489_s25  ;;  %p494_p4 = scmp.lt.u32.totalorder %s737_s16, %s781_s2 }
  0x85   : > { %p495_p10 = scmp.lt.u32.totalorder %s493_s5, %s489_s25  ;;  %p497_p13 = scmp.lt.u32.totalorder %s489_s25, %s737_s16 }
  0x86   : > { %p491_p12 = pnand %p490_p11, %p794_p3 }
  0x87   : > { %p496_p6 = por %p495_p10, %p494_p4 }
  0x88   : > { %p492_p2 = pneg %p491_p12 }
  0x89   : > { %p498_p7 = por %p497_p13, %p496_p6 }
  0x8b   : > { %p499_p5 = pnand %p498_p7, %p492_p2 }
  0x8d   : > { %502 = shalt.err (!%p499_p5)
}
  0x8e   : > { %362 = dma.vmem_to_hbm [thread:$0]  (%p794_p3), %s732_s7, 128, %s737_s16, %s237_s24  }
  0x8f PF: > { %s262_s30 = sand.u32 1, %s533_s9   ;;  %p795_p8 = scmp.ne.s32.totalorder %s787_s22, 0 }
  0x90   : > { %p796_p9 = scmp.ge.s32.totalorder %s545_s12, 2  ;;  %s263_s3 = scalar_lea.sflag [#allocation4], %s262_s30 }
  0x92   : > { %p372_p0 = pnand %p796_p9, %p795_p8 }
  0x94   : > { %528 = dma.done.wait (!%p372_p0), %s263_s3, 128  }
  0x95   : > { %530 = vsyncadd (!%p372_p0), %s263_s3, 4294967168  ;;  %p18_p1 = scmp.ge.s32.totalorder %s590_s15, 4   ;;  %s797_s9 = smov %s537_s10 }
  0x96   : > { %s798_s10 = smov %s541_s11  ;;  %s799_s11 = smov %s602_s18 }
  0x97   : > { %s800_s12 = smov %s590_s15  ;;  %20 = sbr.rel (!%p18_p1) target bundleno = 7 (0x7), region = 86 }
  0x9e   :  { %268 = vsyncpa [#allocation3], 1 }
  0x9f   :  { %270 = vsyncpa [#allocation3 + $0x1], 1 }
  0xa0   :  { %271 = vsyncpa [#allocation6], 1 }
  0xa1   :  { %273 = vsyncpa [#allocation6 + $0x1], 1 }
  0xa2   :  { %274 = vsyncpa [#allocation4], 1 }
  0xa3   :  { %276 = vsyncpa [#allocation4 + $0x1], 1 }

</bundles_post_ra>
